<compile_context>
chip_gen: v7x
topology: tpu7x:2x2x1
jax: 0.10.0
libtpu: 0.0.40
codegen_flags: <defaults>
</compile_context>

<pallas_src>
import functools

import jax
import jax.numpy as jnp
from jax.experimental import pallas as pl
from jax.experimental.pallas import tpu as pltpu

_NEG_BIG = -1e30  # stand-in for -inf; exp underflows to 0 identically
_IN_EPS = 1e-5    # nn.InstanceNorm2d default eps


def _pos_attention_kernel(q_ref, k_ref, v_ref, adj_map_ref, adj_attr_ref,
                          out_ref, *, inv_temperature):
    # Per-grid-step views (Bblk batch elements each):
    #   q/k/v    : (Bblk, C, N)  float32
    #   adj_map  : (Bblk, N, N)  int8   (nonzero == keep)
    #   adj_attr : (Bblk, N, N)  float32
    #   out      : (Bblk, C, N)  float32  (== val transposed; wrapper fixes layout)
    q = q_ref[...] * inv_temperature          # fold 1/temperature into q (C*N work)
    k = k_ref[...]
    v = v_ref[...]
    mask = adj_map_ref[...] != 0
    attr = adj_attr_ref[...]

    # logits[b, n, m] = (1/T) * sum_d q[b, d, n] * k[b, d, m]
    # Batched dot_general: contraction consumed directly, no in-kernel transpose.
    logits = jax.lax.dot_general(
        q, k, (((1,), (1,)), ((0,), (0,))),
        preferred_element_type=jnp.float32)
    logits = attr * logits

    # Masked softmax over the last dim; fully-masked rows become all zeros.
    # TODO(synk): for very large N, tile the key axis with an online softmax so
    # the double-buffered N^2 adjacency blocks stay within VMEM (esp. v7x 64 MiB).
    masked = jnp.where(mask, logits, _NEG_BIG)
    row_max = jnp.max(masked, axis=-1, keepdims=True)
    exps = jnp.where(mask, jnp.exp(masked - row_max), 0.0)
    denom = jnp.sum(exps, axis=-1, keepdims=True)
    safe_denom = jnp.where(denom > 0.0, denom, 1.0)  # fully-masked rows: exps==0
    inv = pl.reciprocal(safe_denom, approx=True)     # EUP slot (otherwise idle)
    inv = inv * (2.0 - safe_denom * inv)             # one Newton step -> ~f32 accuracy
    attn = exps * inv

    # val_cn[b, c, n] = sum_m v[b, c, m] * attn[b, n, m]  (== val[b, n, c])
    val = jax.lax.dot_general(
        v, attn, (((2,), (2,)), ((0,), (0,))),
        preferred_element_type=jnp.float32)          # (Bblk, C, N)

    # InstanceNorm2d on (B, 1, N, C): single channel, affine=False, biased
    # variance -> normalize the whole (N, C) plane per batch. One fused pass.
    cnt = jnp.float32(val.shape[1] * val.shape[2])
    s1 = jnp.sum(val, axis=(1, 2), keepdims=True)
    s2 = jnp.sum(val * val, axis=(1, 2), keepdims=True)
    mean = s1 / cnt
    var = jnp.maximum(s2 / cnt - mean * mean, 0.0)
    out_ref[...] = ((val - mean) * jax.lax.rsqrt(var + _IN_EPS)).astype(out_ref.dtype)


def _choose_batch_block(B, C, N, max_block=8, vmem_budget=24 * 1024 * 1024):
    """Pack batches per grid step to amortize per-step overhead, capped so the
    double-buffered blocks fit the VMEM budget, and keeping >= 2 grid steps when
    B > 1 so both v7x TensorCores get work (no-op concern on v5e/v6e)."""
    per_batch = 4 * C * N * 4 + N * N * (1 + 4)   # q,k,v,out (f32) + mask(i8)+attr(f32)
    fits = max(1, vmem_budget // (2 * per_batch))  # x2 for double buffering
    bblk = int(min(max_block, B, fits))
    while bblk > 1 and pl.cdiv(B, bblk) < 2:
        bblk //= 2
    return max(bblk, 1)


def pos_attention(q, k, v, adj_map, adj_attr, *, temperature, batch_block=None):
    """q, k, v: (B, C, N, 1); adj_map, adj_attr: (B, N, N). Returns (B, 1, N, C)."""
    B, C, N, _ = q.shape
    qs = q[..., 0].astype(jnp.float32)   # (B, C, N)
    ks = k[..., 0].astype(jnp.float32)
    vs = v[..., 0].astype(jnp.float32)
    adj_mask = (adj_map != 0).astype(jnp.int8)   # 4x fewer HBM bytes than f32
    adj_attr_f = adj_attr.astype(jnp.float32)

    bblk = batch_block or _choose_batch_block(B, C, N)
    B_pad = pl.cdiv(B, bblk) * bblk
    if B_pad != B:
        pad = ((0, B_pad - B), (0, 0), (0, 0))
        qs = jnp.pad(qs, pad)
        ks = jnp.pad(ks, pad)
        vs = jnp.pad(vs, pad)
        adj_mask = jnp.pad(adj_mask, pad)      # all-masked rows -> zero output
        adj_attr_f = jnp.pad(adj_attr_f, pad)

    grid = (B_pad // bblk,)
    kernel = functools.partial(_pos_attention_kernel,
                               inv_temperature=1.0 / float(temperature))

    cost = pl.CostEstimate(
        flops=4 * B_pad * C * N * N,                 # two matmuls
        transcendentals=B_pad * N * (N + 1),         # exp + reciprocal
        bytes_accessed=(3 * B_pad * C * N * 4        # q, k, v
                        + B_pad * N * N * (1 + 4)    # adj mask (i8) + attr (f32)
                        + B_pad * C * N * 4))        # output

    out_cn = pl.pallas_call(
        kernel,
        out_shape=jax.ShapeDtypeStruct((B_pad, C, N), jnp.float32),
        grid_spec=pltpu.PrefetchScalarGridSpec(
            num_scalar_prefetch=0,
            grid=grid,
            in_specs=[
                pl.BlockSpec((bblk, C, N), lambda b: (b, 0, 0)),   # q
                pl.BlockSpec((bblk, C, N), lambda b: (b, 0, 0)),   # k
                pl.BlockSpec((bblk, C, N), lambda b: (b, 0, 0)),   # v
                pl.BlockSpec((bblk, N, N), lambda b: (b, 0, 0)),   # adj mask (i8)
                pl.BlockSpec((bblk, N, N), lambda b: (b, 0, 0)),   # adj attr
            ],
            out_specs=pl.BlockSpec((bblk, C, N), lambda b: (b, 0, 0)),
        ),
        compiler_params=pltpu.CompilerParams(
            dimension_semantics=("parallel",),
            vmem_limit_bytes=64 * 1024 * 1024),
        cost_estimate=cost,
    )(qs, ks, vs, adj_mask, adj_attr_f)

    # (B, C, N) -> (B, 1, N, C): layout plumbing handled by XLA outside the kernel.
    return jnp.transpose(out_cn[:B], (0, 2, 1))[:, None, :, :]


def _reference(q, k, v, adj_map, adj_attr, temperature):
    """Pure-JAX reference mirroring the PyTorch forward (for a silent check)."""
    qs, ks, vs = q[..., 0], k[..., 0], v[..., 0]            # (B, C, N)
    logits = jnp.einsum('bdn,bdm->bnm', qs, ks) / temperature
    logits = adj_attr * logits
    mask = adj_map != 0
    ml = jnp.where(mask, logits, _NEG_BIG)
    m = jnp.max(ml, axis=-1, keepdims=True)
    e = jnp.where(mask, jnp.exp(ml - m), 0.0)
    s = jnp.sum(e, axis=-1, keepdims=True)
    attn = jnp.where(s > 0, e / s, 0.0)
    val = jnp.einsum('bnm,bcm->bnc', attn, vs)[:, None, :, :]   # (B, 1, N, C)
    mean = jnp.mean(val, axis=(2, 3), keepdims=True)
    var = jnp.mean((val - mean) ** 2, axis=(2, 3), keepdims=True)
    return (val - mean) / jnp.sqrt(var + _IN_EPS)


if __name__ == "__main__":
    # Module hyperparameters (blocks / sinkhorn_iter / cut_length are unused in
    # the forward path; inchannel only names InstanceNorm2d which is affine=False).
    temperature = 0.7
    B, C, N = 2, 8, 16   # q/k/v: (B, C, N, 1), adj_map/adj_attr: (B, N, N)

    key = jax.random.PRNGKey(0)
    kq, kk, kv, kmap, kattr = jax.random.split(key, 5)
    q = jax.random.normal(kq, (B, C, N, 1), dtype=jnp.float32)
    k = jax.random.normal(kk, (B, C, N, 1), dtype=jnp.float32)
    v = jax.random.normal(kv, (B, C, N, 1), dtype=jnp.float32)
    # adjacency mask: random 0/1 with the diagonal forced on (so no empty rows)
    adj_map = (jax.random.uniform(kmap, (B, N, N)) > 0.5).astype(jnp.float32)
    adj_map = jnp.maximum(adj_map, jnp.eye(N, dtype=jnp.float32)[None])
    adj_attr = jax.random.normal(kattr, (B, N, N), dtype=jnp.float32)

    out = pos_attention(q, k, v, adj_map, adj_attr, temperature=temperature)
    out = jax.block_until_ready(out)

    ref = _reference(q, k, v, adj_map, adj_attr, temperature)
    assert out.shape == (B, 1, N, C)
    assert jnp.allclose(out, ref, atol=1e-3, rtol=1e-3)

    print("KERNEL_OK")
</pallas_src>

<mosaic_0001>
module attributes {stable_mosaic.version = 11 : i64} {
  func.func @_pos_attention_kernel(%arg0: i32, %arg1: memref<1x8x16xf32, #tpu.memory_space<vmem>>, %arg2: memref<1x8x16xf32, #tpu.memory_space<vmem>>, %arg3: memref<1x8x16xf32, #tpu.memory_space<vmem>>, %arg4: memref<1x16x16xi8, #tpu.memory_space<vmem>>, %arg5: memref<1x16x16xf32, #tpu.memory_space<vmem>>, %arg6: memref<1x8x16xf32, #tpu.memory_space<vmem>>) attributes {dimension_semantics = [#tpu.dimension_semantics<parallel>], iteration_bounds = array<i64: 2>, scalar_prefetch = 0 : i64, scratch_operands = 0 : i64, tpu.core_type = #tpu.core_type<tc>, window_params = [{transform_indices = @transform_0, window_bounds = array<i64: 1, 8, 16>}, {transform_indices = @transform_1, window_bounds = array<i64: 1, 8, 16>}, {transform_indices = @transform_2, window_bounds = array<i64: 1, 8, 16>}, {transform_indices = @transform_3, window_bounds = array<i64: 1, 16, 16>}, {transform_indices = @transform_4, window_bounds = array<i64: 1, 16, 16>}, {transform_indices = @transform_5, window_bounds = array<i64: 1, 8, 16>}]} {
    %c0 = arith.constant 0 : index
    %c0_0 = arith.constant 0 : index
    %c0_1 = arith.constant 0 : index
    %0 = vector.load %arg1[%c0, %c0_0, %c0_1] : memref<1x8x16xf32, #tpu.memory_space<vmem>>, vector<1x8x16xf32>
    %cst = arith.constant 1.42857146 : f32
    %1 = vector.broadcast %cst : f32 to vector<1x8x16xf32>
    %2 = arith.mulf %0, %1 : vector<1x8x16xf32>
    %c0_2 = arith.constant 0 : index
    %c0_3 = arith.constant 0 : index
    %c0_4 = arith.constant 0 : index
    %3 = vector.load %arg2[%c0_2, %c0_3, %c0_4] : memref<1x8x16xf32, #tpu.memory_space<vmem>>, vector<1x8x16xf32>
    %c0_5 = arith.constant 0 : index
    %c0_6 = arith.constant 0 : index
    %c0_7 = arith.constant 0 : index
    %4 = vector.load %arg3[%c0_5, %c0_6, %c0_7] : memref<1x8x16xf32, #tpu.memory_space<vmem>>, vector<1x8x16xf32>
    %c0_8 = arith.constant 0 : index
    %c0_9 = arith.constant 0 : index
    %c0_10 = arith.constant 0 : index
    %5 = vector.load %arg4[%c0_8, %c0_9, %c0_10] : memref<1x16x16xi8, #tpu.memory_space<vmem>>, vector<1x16x16xi8>
    %c0_i8 = arith.constant 0 : i8
    %6 = vector.broadcast %c0_i8 : i8 to vector<1x16x16xi8>
    %7 = arith.cmpi ne, %5, %6 : vector<1x16x16xi8>
    %c0_11 = arith.constant 0 : index
    %c0_12 = arith.constant 0 : index
    %c0_13 = arith.constant 0 : index
    %8 = vector.load %arg5[%c0_11, %c0_12, %c0_13] : memref<1x16x16xf32, #tpu.memory_space<vmem>>, vector<1x16x16xf32>
    %cst_14 = arith.constant dense<0.000000e+00> : vector<1x16x16xf32>
    %9 = tpu.matmul %2, %3, %cst_14 {dimension_numbers = #tpu.dot_dimension_numbers<[1], [1], [2], [2], [0, 0, 0, 2, 1, 2], [0], [0]>} : vector<1x8x16xf32>, vector<1x8x16xf32>, vector<1x16x16xf32> -> vector<1x16x16xf32>
    %10 = arith.mulf %8, %9 : vector<1x16x16xf32>
    %cst_15 = arith.constant -1.000000e+30 : f32
    %11 = vector.broadcast %cst_15 : f32 to vector<1x16x16xf32>
    %12 = arith.select %7, %10, %11 : vector<1x16x16xi1>, vector<1x16x16xf32>
    %cst_16 = arith.constant dense<0xFF800000> : vector<1x16xf32>
    %13 = vector.multi_reduction <maximumf>, %12, %cst_16 [2] : vector<1x16x16xf32> to vector<1x16xf32>
    %14 = vector.shape_cast %13 : vector<1x16xf32> to vector<1x16x1xf32>
    %15 = vector.broadcast %14 : vector<1x16x1xf32> to vector<1x16x16xf32>
    %16 = arith.subf %12, %15 : vector<1x16x16xf32>
    %17 = math.exp %16 : vector<1x16x16xf32>
    %cst_17 = arith.constant 0.000000e+00 : f32
    %18 = vector.broadcast %cst_17 : f32 to vector<1x16x16xf32>
    %19 = arith.select %7, %17, %18 : vector<1x16x16xi1>, vector<1x16x16xf32>
    %cst_18 = arith.constant dense<0.000000e+00> : vector<1x16xf32>
    %20 = vector.multi_reduction <add>, %19, %cst_18 [2] : vector<1x16x16xf32> to vector<1x16xf32>
    %21 = vector.shape_cast %20 : vector<1x16xf32> to vector<1x16x1xf32>
    %cst_19 = arith.constant 0.000000e+00 : f32
    %22 = vector.broadcast %cst_19 : f32 to vector<1x16x1xf32>
    %23 = arith.cmpf ogt, %21, %22 : vector<1x16x1xf32>
    %cst_20 = arith.constant 1.000000e+00 : f32
    %24 = vector.broadcast %cst_20 : f32 to vector<1x16x1xf32>
    %25 = arith.select %23, %21, %24 : vector<1x16x1xi1>, vector<1x16x1xf32>
    %26 = tpu.reciprocal %25 {approx = true} : vector<1x16x1xf32> -> vector<1x16x1xf32>
    %27 = arith.mulf %25, %26 : vector<1x16x1xf32>
    %cst_21 = arith.constant 2.000000e+00 : f32
    %28 = vector.broadcast %cst_21 : f32 to vector<1x16x1xf32>
    %29 = arith.subf %28, %27 : vector<1x16x1xf32>
    %30 = arith.mulf %26, %29 : vector<1x16x1xf32>
    %31 = vector.broadcast %30 : vector<1x16x1xf32> to vector<1x16x16xf32>
    %32 = arith.mulf %19, %31 : vector<1x16x16xf32>
    %cst_22 = arith.constant dense<0.000000e+00> : vector<1x8x16xf32>
    %33 = tpu.matmul %4, %32, %cst_22 {dimension_numbers = #tpu.dot_dimension_numbers<[2], [2], [1], [1], [0, 0, 0, 1, 1, 1], [0], [0]>} : vector<1x8x16xf32>, vector<1x16x16xf32>, vector<1x8x16xf32> -> vector<1x8x16xf32>
    %cst_23 = arith.constant dense<0.000000e+00> : vector<1xf32>
    %34 = vector.multi_reduction <add>, %33, %cst_23 [1, 2] : vector<1x8x16xf32> to vector<1xf32>
    %35 = vector.shape_cast %34 : vector<1xf32> to vector<1x1x1xf32>
    %36 = arith.mulf %33, %33 : vector<1x8x16xf32>
    %cst_24 = arith.constant dense<0.000000e+00> : vector<1xf32>
    %37 = vector.multi_reduction <add>, %36, %cst_24 [1, 2] : vector<1x8x16xf32> to vector<1xf32>
    %38 = vector.shape_cast %37 : vector<1xf32> to vector<1x1x1xf32>
    %cst_25 = arith.constant 1.280000e+02 : f32
    %39 = vector.broadcast %cst_25 : f32 to vector<1x1x1xf32>
    %40 = arith.divf %35, %39 : vector<1x1x1xf32>
    %cst_26 = arith.constant 1.280000e+02 : f32
    %41 = vector.broadcast %cst_26 : f32 to vector<1x1x1xf32>
    %42 = arith.divf %38, %41 : vector<1x1x1xf32>
    %43 = arith.mulf %40, %40 : vector<1x1x1xf32>
    %44 = arith.subf %42, %43 : vector<1x1x1xf32>
    %cst_27 = arith.constant 0.000000e+00 : f32
    %45 = vector.broadcast %cst_27 : f32 to vector<1x1x1xf32>
    %46 = arith.maximumf %44, %45 : vector<1x1x1xf32>
    %47 = vector.broadcast %40 : vector<1x1x1xf32> to vector<1x8x16xf32>
    %48 = arith.subf %33, %47 : vector<1x8x16xf32>
    %cst_28 = arith.constant 9.99999974E-6 : f32
    %49 = vector.broadcast %cst_28 : f32 to vector<1x1x1xf32>
    %50 = arith.addf %46, %49 : vector<1x1x1xf32>
    %51 = math.rsqrt %50 : vector<1x1x1xf32>
    %52 = vector.broadcast %51 : vector<1x1x1xf32> to vector<1x8x16xf32>
    %53 = arith.mulf %48, %52 : vector<1x8x16xf32>
    %c0_29 = arith.constant 0 : index
    %c0_30 = arith.constant 0 : index
    %c0_31 = arith.constant 0 : index
    %54 = vector.load %arg6[%c0_29, %c0_30, %c0_31] : memref<1x8x16xf32, #tpu.memory_space<vmem>>, vector<1x8x16xf32>
    tpu.vector_store %arg6[%c0_29, %c0_30, %c0_31], %53 {strides = array<i32>} : memref<1x8x16xf32, #tpu.memory_space<vmem>>, vector<1x8x16xf32>,
    return
  }
  func.func @transform_0(%arg0: i32) -> (i32, i32, i32) {
    %c0_i32 = arith.constant 0 : i32
    %c0_i32_0 = arith.constant 0 : i32
    %c0_i32_1 = arith.constant 0 : i32
    return %arg0, %c0_i32, %c0_i32_0 : i32, i32, i32
  }
  func.func @transform_1(%arg0: i32) -> (i32, i32, i32) {
    %c0_i32 = arith.constant 0 : i32
    %c0_i32_0 = arith.constant 0 : i32
    %c0_i32_1 = arith.constant 0 : i32
    return %arg0, %c0_i32, %c0_i32_0 : i32, i32, i32
  }
  func.func @transform_2(%arg0: i32) -> (i32, i32, i32) {
    %c0_i32 = arith.constant 0 : i32
    %c0_i32_0 = arith.constant 0 : i32
    %c0_i32_1 = arith.constant 0 : i32
    return %arg0, %c0_i32, %c0_i32_0 : i32, i32, i32
  }
  func.func @transform_3(%arg0: i32) -> (i32, i32, i32) {
    %c0_i32 = arith.constant 0 : i32
    %c0_i32_0 = arith.constant 0 : i32
    %c0_i32_1 = arith.constant 0 : i32
    return %arg0, %c0_i32, %c0_i32_0 : i32, i32, i32
  }
  func.func @transform_4(%arg0: i32) -> (i32, i32, i32) {
    %c0_i32 = arith.constant 0 : i32
    %c0_i32_0 = arith.constant 0 : i32
    %c0_i32_1 = arith.constant 0 : i32
    return %arg0, %c0_i32, %c0_i32_0 : i32, i32, i32
  }
  func.func @transform_5(%arg0: i32) -> (i32, i32, i32) {
    %c0_i32 = arith.constant 0 : i32
    %c0_i32_0 = arith.constant 0 : i32
    %c0_i32_1 = arith.constant 0 : i32
    return %arg0, %c0_i32, %c0_i32_0 : i32, i32, i32
  }
}

</mosaic_0001>

<bundles_post_ra>
// kernel: tpu_custom_call.1
= control target key start
LH: loop header
LB: loop body
LE: loop exit
PB: predicated region body
PF: predicated region fallthrough
CT: control target
= control target key end

     0   :  { %s1590_s0 = inlined_call_operand.hbm [shape: f32[2,8,16], index: 0, kind: input, shape index: {}]   ;;  %s1591_s1 = inlined_call_operand.hbm [shape: f32[2,8,16], index: 1, kind: input, shape index: {}]   ;;  %s1592_s2 = inlined_call_operand.hbm [shape: f32[2,8,16], index: 2, kind: input, shape index: {}]   ;;  %s1593_s3 = inlined_call_operand.hbm [shape: s8[2,16,16], index: 3, kind: input, shape index: {}]   ;;  %s1594_s4 = inlined_call_operand.hbm [shape: f32[2,16,16], index: 4, kind: input, shape index: {}]   ;;  %s1595_s5 = inlined_call_operand.hbm [shape: f32[2,8,16], index: 5, kind: output, shape index: {}]  }
   0x1   :  { %1605 = sst [smem:[#allocation20_spill]] %s1591_s1 }
   0x2   :  { %1606 = sst [smem:[#allocation21_spill]] %s1593_s3 }
   0x3   :  { %10 = vsyncpa [#allocation3], 0 }
   0x4   :  { %12 = vsyncpa [#allocation3 + $0x1], 0 }
   0x5   :  { %13 = vsyncpa [#allocation6], 0 }
   0x6   :  { %15 = vsyncpa [#allocation6 + $0x1], 0 }
   0x7   :  { %16 = vsyncpa [#allocation9], 0 }
   0x8   :  { %18 = vsyncpa [#allocation9 + $0x1], 0 }
   0x9   :  { %19 = vsyncpa [#allocation4], 0 }
   0xa   :  { %21 = vsyncpa [#allocation4 + $0x1], 0  ;;  %s1247_s18 = smov 0   ;;  %s1249_s19 = smov 0  }
   0xb   :  { %s1251_s20 = smov 0   ;;  %s1253_s21 = smov 0  }
   0xc LB: > { %1607 = sst [smem:[#allocation16_spill]] %s1197_s20  ;;  %s1268_s22 = sadd.s32 4294967295, %s1201_s21   ;;  %s1201_s21 = sphi %s1253_s21, %s1631_s21   ;;  %s1197_s20 = sphi %s1251_s20, %s1633_s20   ;;  %s1193_s19 = sphi %s1249_s19, %s1635_s19   ;;  %s1189_s18 = sphi %s1247_s18, %s1634_s18  }
   0xd   : > { %s838_s23 = sadd.s32 4294967294, %s1201_s21   ;;  %s1272_s24 = sadd.s32 1, %s1201_s21  }
   0xe   : > { %1608 = sst [smem:[#allocation17_spill]] %s1272_s24  ;;  %s34_s25 = sadd.s32 1, %s1197_s20 }
   0xf   : > { %s31_s26 = ssub.s32 %s1201_s21, %s1272_s24  ;;  %p41_p0 = scmp.ne.s32.totalorder %s1197_s20, %s1193_s19 }
  0x10   : > { %p32_p1 = scmp.eq.s32.totalorder %s31_s26, 0  ;;  %p42_p2 = scmp.eq.s32.totalorder %s1201_s21, 0 }
  0x11   : > { %p47_p3 = scmp.ne.s32.totalorder %s1193_s19, %s1189_s18  ;;  %p48_p4 = scmp.eq.s32.totalorder %s1268_s22, 0 }
  0x12   : > { %s1284_s27 = scalar_select %p32_p1, %s1197_s20, %s34_s25  }
  0x13   : > { %p43_p5 = por %p42_p2, %p41_p0  ;;  %p1286_p6 = por %p48_p4, %p47_p3 }
  0x14   : > { %1609 = sst [smem:[#allocation18_spill]] %s1284_s27  ;;  %p175_p7 = scmp.eq.s32.totalorder %s1268_s22, 1 }
  0x15   : > { %s1610_s28 = scalar_select %p1286_p6, 1, 0 }
  0x16   : > { %p181_p8 = scmp.eq.s32.totalorder %s838_s23, 1  ;;  %p925_p10 = scmp.lt.s32.totalorder %s1201_s21, 2 }
  0x17   : > { %p1293_p11 = por %p175_p7, %p41_p0  ;;  %s1302_s6 = sand.u32 1, %s1197_s20  }
  0x18   : > { %p1297_p12 = por %p181_p8, %p47_p3  ;;  %s1305_s7 = sshll.u32 %s1201_s21, 7 }
  0x19   : > { %s1611_s29 = scalar_select %p1293_p11, 1, 0 }
  0x1a   : > { %s1612_s30 = scalar_select %p1297_p12, 1, 0 }
  0x1b   : > { %s1308_s8 = sshll.u32 %s1302_s6, 3  ;;  %p1310_p13 = pnand %p925_p10, %p43_p5 }
  0x1c   : > { %1613 = sst [smem:[#allocation19_spill]] %s1612_s30  ;;  %s1596_s10 = sand.u32 1, %s1201_s21  }
  0x1d   : > { %s1614_s9 = scalar_select %p1310_p13, 1, 0 }
  0x1e   : > { %s1615_s1 = sld [smem:[#allocation20_spill]]  ;;  %s223_s14 = scalar_lea.vmem [#allocation5], %s1308_s8 }
  0x1f   : > { %s230_s15 = sshll.u32 %s223_s14, 4  ;;  %s1326_s16 = scalar_lea.sflag [#allocation6], %s1596_s10  ;;  %s1322_s15 = int_to_ptr.vmem [resolvable:$true] %s230_s15 }
  0x20   : > { %p1332_p1 = pneg %p1310_p13 }
  0x24   : > { %s1319_s13 = scalar_lea.hbm %s1615_s1, %s1305_s7  ;;  %s982_s11 = scalar_lea.hbm %s1615_s1, 256 }
  0x25   : > { %s977_s17 = scalar_lea.hbm %s1319_s13, 128  ;;  %p983_p4 = scmp.lt.u32.totalorder %s1319_s13, %s1615_s1 }
  0x26   : > { %p978_p0 = scmp.ne.s32.totalorder %s1319_s13, %s977_s17  ;;  %p984_p5 = scmp.lt.u32.totalorder %s982_s11, %s977_s17 }
  0x27   : > { %p986_p8 = scmp.lt.u32.totalorder %s977_s17, %s1319_s13 }
  0x28   : > { %p980_p2 = pnand %p1332_p1, %p978_p0  ;;  %p985_p7 = por %p984_p5, %p983_p4 }
  0x2a   : > { %p981_p3 = pneg %p980_p2  ;;  %p987_p10 = por %p986_p8, %p985_p7 }
  0x2c   : > { %p988_p9 = pnand %p987_p10, %p981_p3 }
  0x2e   : > { %991 = shalt.err (!%p988_p9)
}
  0x2f   : > { %s992_s10 = scalar_lea.vmem %s1322_s15, 128  ;;  %s1203_s25 = smov [#allocation5]  }
  0x30   : > { %p993_p0 = scmp.ne.s32.totalorder %s1322_s15, %s992_s10  ;;  %s997_s26 = sshll.u32 %s1203_s25, 4  ;;  %s998_s26 = int_to_ptr.vmem [resolvable:$false] %s997_s26 }
  0x31   : > { %s999_s12 = scalar_lea.vmem %s998_s26, 256  ;;  %p1000_p11 = scmp.lt.s32.totalorder %s1322_s15, %s998_s26 }
  0x32   : > { %p995_p2 = pnand %p993_p0, %p1332_p1  ;;  %p1001_p6 = scmp.lt.s32.totalorder %s999_s12, %s992_s10 }
  0x34   : > { %p996_p12 = pneg %p995_p2  ;;  %p1002_p4 = por %p1001_p6, %p1000_p11 }
  0x36   : > { %p1003_p5 = pnand %p1002_p4, %p996_p12 }
  0x38   : > { %1006 = shalt.err (!%p1003_p5)
}
  0x39   : > { %911 = dma.hbm_to_vmem [thread:$0]  (!%p1310_p13), %s1319_s13, 128, %s1322_s15, %s1326_s16  }
  0x3a   : > { %p853_p9 = scmp.ge.s32.totalorder %s1201_s21, 1  ;;  %p295_p3 = scmp.lt.s32.totalorder %s1201_s21, 3 }
  0x3b   : > { %s847_s17 = sshll.u32 %s1302_s6, 2  ;;  %s869_s11 = sshll.u32 %s1201_s21, 6 }
  0x3c   : > { %p1360_p7 = pnand %p853_p9, %p295_p3  ;;  %s1618_s3 = sld [smem:[#allocation21_spill]] }
  0x3d   : > { %s259_s12 = scalar_lea.vmem [#allocation8], %s847_s17  ;;  %s1619_s13 = sand.u32 1, %s1201_s21  }
  0x3e   : > { %s1617_s10 = scalar_select %p1360_p7, 1, 0 }
  0x3f   : > { %s266_s1 = sshll.u32 %s259_s12, 4  ;;  %s1373_s15 = scalar_lea.sflag [#allocation9], %s1619_s13  ;;  %s1369_s1 = int_to_ptr.vmem [resolvable:$true] %s266_s1 }
  0x42   : > { %s1367_s26 = scalar_lea.hbm %s1618_s3, %s869_s11  ;;  %s1012_s11 = scalar_lea.hbm %s1618_s3, 128 }
  0x43   : > { %s1007_s27 = scalar_lea.hbm %s1367_s26, 64  ;;  %p1013_p8 = scmp.lt.u32.totalorder %s1367_s26, %s1618_s3 }
  0x44   : > { %p1008_p6 = scmp.ne.s32.totalorder %s1367_s26, %s1007_s27  ;;  %p1014_p10 = scmp.lt.u32.totalorder %s1012_s11, %s1007_s27 }
  0x45   : > { %p1016_p2 = scmp.lt.u32.totalorder %s1007_s27, %s1367_s26 }
  0x46   : > { %p1010_p11 = pnand %p1008_p6, %p1332_p1  ;;  %p1015_p0 = por %p1014_p10, %p1013_p8 }
  0x48   : > { %p1011_p12 = pneg %p1010_p11  ;;  %p1017_p4 = por %p1016_p2, %p1015_p0 }
  0x4a   : > { %p1018_p5 = pnand %p1017_p4, %p1011_p12 }
  0x4c   : > { %1021 = shalt.err (!%p1018_p5)
}
  0x4d   : > { %s1022_s17 = scalar_lea.vmem %s1369_s1, 64  ;;  %s1204_s20 = smov [#allocation8]  }
  0x4e   : > { %p1023_p9 = scmp.ne.s32.totalorder %s1369_s1, %s1022_s17  ;;  %s1027_s12 = sshll.u32 %s1204_s20, 4  ;;  %s1028_s12 = int_to_ptr.vmem [resolvable:$false] %s1027_s12 }
  0x4f   : > { %s1029_s24 = scalar_lea.vmem %s1028_s12, 128  ;;  %p1030_p11 = scmp.lt.s32.totalorder %s1369_s1, %s1028_s12 }
  0x50   : > { %p1025_p3 = pnand %p1023_p9, %p1332_p1  ;;  %p1031_p7 = scmp.lt.s32.totalorder %s1029_s24, %s1022_s17 }
  0x52   : > { %p1026_p6 = pneg %p1025_p3  ;;  %p1032_p8 = por %p1031_p7, %p1030_p11 }
  0x54   : > { %p1033_p10 = pnand %p1032_p8, %p1026_p6 }
  0x56   : > { %1036 = shalt.err (!%p1033_p10)
}
  0x57   : > { %s1205_s27 = smov 32   ;;  %s1206_s13 = smov 2  }
  0x58   : > { %917 = dma.hbm_to_vmem [thread:$0]  (!%p1310_p13), %s1367_s26, 64, %s1369_s1, %s1373_s15, %s1205_s27, %s1205_s27, %s1206_s13  }
  0x59   : > { %s1401_s25 = scalar_lea.hbm %s1590_s0, %s1305_s7  ;;  %s205_s17 = scalar_lea.vmem [#allocation2], %s1308_s8 }
  0x5a   : > { %s212_s20 = sshll.u32 %s205_s17, 4  ;;  %s1410_s3 = scalar_lea.hbm %s1592_s2, %s1305_s7  ;;  %s1404_s20 = int_to_ptr.vmem [resolvable:$true] %s212_s20 }
  0x5b   : > { %s202_s30 = scalar_lea.sflag [#allocation3], %s1302_s6  ;;  %s1037_s1 = scalar_lea.hbm %s1401_s25, 128 }
  0x5c   : > { %p1038_p7 = scmp.ne.s32.totalorder %s1401_s25, %s1037_s1  ;;  %s1042_s13 = scalar_lea.hbm %s1590_s0, 256 }
  0x5d   : > { %p1043_p2 = scmp.lt.u32.totalorder %s1401_s25, %s1590_s0  ;;  %p1044_p4 = scmp.lt.u32.totalorder %s1042_s13, %s1037_s1 }
  0x5e   : > { %p1040_p12 = pnand %p1038_p7, %p1332_p1  ;;  %p1046_p9 = scmp.lt.u32.totalorder %s1037_s1, %s1401_s25 }
  0x5f   : > { %p1045_p5 = por %p1044_p4, %p1043_p2 }
  0x60   : > { %p1041_p0 = pneg %p1040_p12 }
  0x61   : > { %p1047_p3 = por %p1046_p9, %p1045_p5 }
  0x63   : > { %p1048_p6 = pnand %p1047_p3, %p1041_p0 }
  0x65   : > { %1051 = shalt.err (!%p1048_p6)
}
  0x66   : > { %s1052_s7 = scalar_lea.vmem %s1404_s20, 128  ;;  %s1207_s17 = smov [#allocation2]  }
  0x67   : > { %p1053_p11 = scmp.ne.s32.totalorder %s1404_s20, %s1052_s7  ;;  %s1057_s12 = sshll.u32 %s1207_s17, 4  ;;  %s1058_s12 = int_to_ptr.vmem [resolvable:$false] %s1057_s12 }
  0x68   : > { %s1059_s24 = scalar_lea.vmem %s1058_s12, 256  ;;  %p1060_p7 = scmp.lt.s32.totalorder %s1404_s20, %s1058_s12 }
  0x69   : > { %p1055_p8 = pnand %p1053_p11, %p1332_p1  ;;  %p1061_p12 = scmp.lt.s32.totalorder %s1059_s24, %s1052_s7 }
  0x6b   : > { %p1056_p10 = pneg %p1055_p8  ;;  %p1062_p2 = por %p1061_p12, %p1060_p7 }
  0x6d   : > { %p1063_p4 = pnand %p1062_p2, %p1056_p10 }
  0x6f   : > { %1066 = shalt.err (!%p1063_p4)
}
  0x70   : > { %908 = dma.hbm_to_vmem [thread:$0]  (!%p1310_p13), %s1401_s25, 128, %s1404_s20, %s202_s30  }
  0x71   : > { %s241_s1 = scalar_lea.vmem [#allocation7], %s1308_s8  ;;  %s850_s27 = sshll.u32 %s1302_s6, 4 }
  0x72   : > { %s248_s26 = sshll.u32 %s241_s1, 4  ;;  %s1067_s13 = scalar_lea.hbm %s1410_s3, 128  ;;  %s249_s26 = int_to_ptr.vmem [resolvable:$true] %s248_s26 }
  0x73   : > { %p1068_p0 = scmp.ne.s32.totalorder %s1410_s3, %s1067_s13  ;;  %s1072_s7 = scalar_lea.hbm %s1592_s2, 256 }
  0x74   : > { %p1073_p3 = scmp.lt.u32.totalorder %s1410_s3, %s1592_s2  ;;  %p1074_p6 = scmp.lt.u32.totalorder %s1072_s7, %s1067_s13 }
  0x75   : > { %p1070_p5 = pnand %p1068_p0, %p1332_p1  ;;  %p1076_p8 = scmp.lt.u32.totalorder %s1067_s13, %s1410_s3 }
  0x76   : > { %p1075_p11 = por %p1074_p6, %p1073_p3 }
  0x77   : > { %p1071_p9 = pneg %p1070_p5 }
  0x78   : > { %p1077_p10 = por %p1076_p8, %p1075_p11 }
  0x7a   : > { %p1078_p7 = pnand %p1077_p10, %p1071_p9 }
  0x7c   : > { %1081 = shalt.err (!%p1078_p7)
}
  0x7d   : > { %s1082_s30 = scalar_lea.vmem %s249_s26, 128  ;;  %s1208_s8 = smov [#allocation7]  }
  0x7e   : > { %p1083_p12 = scmp.ne.s32.totalorder %s249_s26, %s1082_s30  ;;  %s1087_s25 = sshll.u32 %s1208_s8, 4  ;;  %s1088_s25 = int_to_ptr.vmem [resolvable:$false] %s1087_s25 }
  0x7f   : > { %s1089_s20 = scalar_lea.vmem %s1088_s25, 256  ;;  %p1090_p0 = scmp.lt.s32.totalorder %s249_s26, %s1088_s25 }
  0x80   : > { %p1085_p2 = pnand %p1083_p12, %p1332_p1  ;;  %p1091_p5 = scmp.lt.s32.totalorder %s1089_s20, %s1082_s30 }
  0x82   : > { %p1086_p4 = pneg %p1085_p2  ;;  %p1092_p13 = por %p1091_p5, %p1090_p0 }
  0x84   : > { %p1093_p3 = pnand %p1092_p13, %p1086_p4 }
  0x86   : > { %1096 = shalt.err (!%p1093_p3)
}
  0x87   : > { %p1620_p6 = scmp.ne.s32.totalorder %s1614_s9, 0  ;;  %s870_s24 = sshll.u32 %s1201_s21, 8 }
  0x88   : > { %s280_s1 = scalar_lea.vmem [#allocation10], %s850_s27  ;;  %s1460_s7 = scalar_lea.hbm %s1594_s4, %s870_s24 }
  0x89   : > { %914 = dma.hbm_to_vmem [thread:$0]  (!%p1620_p6), %s1410_s3, 128, %s249_s26, %s1326_s16  }
  0x8a   : > { %s287_s13 = sshll.u32 %s280_s1, 4  ;;  %s1097_s17 = scalar_lea.hbm %s1460_s7, 256  ;;  %s1462_s13 = int_to_ptr.vmem [resolvable:$true] %s287_s13 }
  0x8b   : > { %p1098_p13 = scmp.ne.s32.totalorder %s1460_s7, %s1097_s17  ;;  %s1102_s16 = scalar_lea.hbm %s1594_s4, 512 }
  0x8c   : > { %p1103_p8 = scmp.lt.u32.totalorder %s1460_s7, %s1594_s4  ;;  %p1104_p10 = scmp.lt.u32.totalorder %s1102_s16, %s1097_s17 }
  0x8d   : > { %p1100_p9 = pnand %p1098_p13, %p1332_p1  ;;  %p1106_p12 = scmp.lt.u32.totalorder %s1097_s17, %s1460_s7 }
  0x8e   : > { %p1105_p7 = por %p1104_p10, %p1103_p8 }
  0x8f   : > { %p1101_p11 = pneg %p1100_p9 }
  0x90   : > { %p1107_p2 = por %p1106_p12, %p1105_p7 }
  0x92   : > { %p1108_p4 = pnand %p1107_p2, %p1101_p11 }
  0x94   : > { %1111 = shalt.err (!%p1108_p4)
}
  0x95   : > { %s1112_s12 = scalar_lea.vmem %s1462_s13, 256  ;;  %s1209_s30 = smov [#allocation10]  }
  0x96   : > { %p1113_p0 = scmp.ne.s32.totalorder %s1462_s13, %s1112_s12  ;;  %s1117_s8 = sshll.u32 %s1209_s30, 4  ;;  %s1118_s8 = int_to_ptr.vmem [resolvable:$false] %s1117_s8 }
  0x97   : > { %s1119_s25 = scalar_lea.vmem %s1118_s8, 512  ;;  %p1120_p13 = scmp.lt.s32.totalorder %s1462_s13, %s1118_s8 }
  0x98   : > { %p1115_p5 = pnand %p1113_p0, %p1332_p1  ;;  %p1121_p9 = scmp.lt.s32.totalorder %s1119_s25, %s1112_s12 }
  0x9a   : > { %p1116_p3 = pneg %p1115_p5  ;;  %p1122_p8 = por %p1121_p9, %p1120_p13 }
  0x9c   : > { %p1123_p10 = pnand %p1122_p8, %p1116_p3 }
  0x9e   : > { %1126 = shalt.err (!%p1123_p10)
}
  0x9f   : > { %s1210_s20 = smov 128   ;;  %s1211_s24 = smov 8  }
  0xa0   : > { %920 = dma.hbm_to_vmem [thread:$0]  (!%p1620_p6), %s1460_s7, 256, %s1462_s13, %s1373_s15, %s1210_s20, %s1210_s20, %s1211_s24  }
  0xa1   : > { %p1621_p1 = scmp.ne.s32.totalorder %s1617_s10, 0 }
  0xa2   : > { %s1489_s23 = sand.u32 (!%p1621_p1), 1, %s1193_s19   ;;  %p1622_p11 = scmp.ne.s32.totalorder (!%p1621_p1), %s1610_s28, 0 }
  0xa3   : > { %299 = sbr.rel (%p1621_p1) target bundleno = 1271 (0x4f7), region = 40  ;;  %s1492_s1 = sshll.u32 (!%p1621_p1), %s1489_s23, 3 }
  0xa4   : > { %s302_s14 = scalar_lea.sflag (!%p1621_p1), [#allocation3], %s1489_s23  ;;  %s305_s11 = scalar_lea.vmem (!%p1621_p1), [#allocation2], %s1492_s1 }
  0xaa   : > { %1172 = dma.done.wait (%p1622_p11), %s302_s14, 128  }
  0xab   : > { %1174 = vsyncadd (%p1622_p11), %s302_s14, 4294967168  ;;  %s310_s9 = sand.u32 1, %s1268_s22   ;;  %s314_s15 = scalar_lea.vmem [#allocation5], %s1492_s1 }
  0xac   : > { %s311_s10 = scalar_lea.sflag [#allocation6], %s310_s9 }
  0xad   : > { %1176 = dma.done.wait (%p1622_p11), %s311_s10, 256  }
  0xae   : > { %1178 = vsyncadd (%p1622_p11), %s311_s10, 4294967040  ;;  %s857_s13 = sshll.u32 %s1489_s23, 2  ;;  %s323_s7 = scalar_lea.vmem [#allocation7], %s1492_s1 }
  0xaf   : > { %s329_s17 = scalar_lea.sflag [#allocation9], %s310_s9  ;;  %s332_s3 = scalar_lea.vmem [#allocation8], %s857_s13 }
  0xb0   : > { %1180 = dma.done.wait (%p1622_p11), %s329_s17, 320  }
  0xb1   : > { %1182 = vsyncadd (%p1622_p11), %s329_s17, 4294966976  ;;  %v390_v0 = vld [vmem:[%s305_s11] sm:$0xff]  ;;  %v392_v2 = vld [vmem:[%s314_s15] sm:$0xff]  ;;  %vm432_vm0 = vcmask 64512   ;;  %s858_s6 = sshll.u32 %s1489_s23, 4  ;;  %v1212_v7 = vmov 0  }
  0xb2   : > { %v391_v1 = vmul.f32 1.4285715, %v390_v0  ;;  %877 = vmatprep.subr.mxu0 %v392_v2  ;;  %v395_v5 = vld [vmem:[%s332_s3 + $0x2] sm:$0x3]  ;;  %v394_v6 = vld [vmem:[%s332_s3] sm:$0x3] }
  0xb3   : > { %878 = vmatpush3.msra.mxu0 %v392_v2  ;;  %vm397_vm1 = vnez %v395_v5  ;;  %vm396_vm2 = vnez %v394_v6  ;;  %s341_s28 = scalar_lea.vmem [#allocation10], %s858_s6  ;;  %vm524_vm4 = vcmask 130048   ;;  %v1213_v36 = vmov 0.0|0.0   ;;  %v393_v53 = vld [vmem:[%s323_s7] sm:$0xff]  ;;  %s866_s16 = sshll.u32 %s1268_s22, 7 }
  0xb4   : > { %400 = vxpose.xlu0.b32.start.end [1/1] (short) (narrow) %v391_v1, 16  ;;  %v517_v8 = vsel %vm397_vm1, 16843009, %v1212_v7  ;;  %v516_v9 = vsel %vm396_vm2, 16843009, %v1212_v7  ;;  %v399_v12 = vld [vmem:[%s341_s28 + $0x8] sm:$0xff]  ;;  %889 = vmatprep.subr.bf16.mxu1 %v1213_v36  ;;  %vm891_vm9 = vmpackc.low %vm524_vm4, %vm524_vm4  ;;  %s1545_s8 = scalar_lea.hbm %s1595_s5, %s866_s16 }
  0xb5   : > { %v519_v10 = vunpack.c.0.s8 %v517_v8  ;;  %v518_v11 = vunpack.c.0.s8 %v516_v9  ;;  %v398_v13 = vld [vmem:[%s341_s28] sm:$0xff]  ;;  %vm1214_vm6 = vmmov 0   ;;  %v1215_v37 = vmov 0.0   ;;  %s387_s26 = scalar_lea.vmem [#allocation11], %s1492_s1  ;;  %s669_s25 = scalar_lea.sflag [#allocation4], %s1489_s23 }
  0xb6   : > { %886 = vmatprep.mubr.msk.f32.mxu1 %vm1214_vm6, %v1215_v37  ;;  %s682_s27 = sshll.u32 %s387_s26, 4  ;;  %p1627_p7 = scmp.ne.s32.totalorder %s1611_s29, 0  ;;  %s1547_s27 = int_to_ptr.vmem [resolvable:$true] %s682_s27 }
  0xb7   : > { %vm1513_vm3 = vcmp.ne.s32.totalorder %v519_v10, 0  ;;  %vm1517_vm5 = vcmp.ne.s32.totalorder %v518_v11, 0  ;;  %s1127_s20 = scalar_lea.vmem %s1547_s27, 128  ;;  %s1216_s22 = smov [#allocation11]  }
  0xb8   : > { %p1128_p6 = scmp.ne.s32.totalorder %s1547_s27, %s1127_s20  ;;  %s1131_s24 = sshll.u32 %s1216_s22, 4  ;;  %s1132_s24 = int_to_ptr.vmem [resolvable:$false] %s1131_s24 }
  0xb9   : > { %s1133_s1 = scalar_lea.vmem %s1132_s24, 256  ;;  %p1134_p4 = scmp.lt.s32.totalorder %s1547_s27, %s1132_s24 }
  0xba   : > { %p1129_p12 = pnand %p1128_p6, %p1627_p7  ;;  %p1135_p0 = scmp.lt.s32.totalorder %s1133_s1, %s1127_s20 }
  0xbc   : > { %p1130_p2 = pneg %p1129_p12  ;;  %p1136_p5 = por %p1135_p0, %p1134_p4 }
  0xbe   : > { %p1137_p3 = pnand %p1136_p5, %p1130_p2 }
 0x134   : > { %v416_v3 = vpop.trf.xlu0 }
 0x135   : > { %879 = vmatprep.mubr.msk.f32.mxu0 %vm432_vm0, %v416_v3 }
 0x138   : > { %v417_v4 = vpop.trf.xlu0 }
 0x139   : > { %880 = vmatmul.mubr.msk.f32.vlgmr.msra.gmra.mrb[0].mxu0 %vm432_vm0, %v417_v4 }
 0x20c   : > { %v881_v14 = vpop.f32.mrb[0].mxu0 }
 0x20d   : > { %v515_v16 = vmul.f32 %v881_v14, %v399_v12  ;;  %v505_v17 = vpop.f32.mrb[1].mxu0 }
 0x20e   : > { %v514_v19 = vmul.f32 %v505_v17, %v398_v13 }
 0x20f   : > { %v523_v20 = vsel %vm1513_vm3, %v515_v16, -1e+30 }
 0x210   : > { %v528_v21 = vsel %vm524_vm4, %v523_v20, -inf  ;;  %v522_v22 = vsel %vm1517_vm5, %v514_v19, -1e+30 }
 0x211   : > { %529 = vmax.xlane.f32.xlu1 %v528_v21  ;;  %v525_v23 = vsel %vm524_vm4, %v522_v22, -inf }
 0x212   : > { %526 = vmax.xlane.f32.xlu0 %v525_v23 }
 0x29e   : > { %v530_v24 = vpop.xlane.xlu1 %529 }
 0x29f   : > { %v532_v25 = vsub.f32 %v523_v20, %v530_v24  ;;  %v527_v26 = vpop.xlane.xlu0 %526 }
 0x2a0   : > { %v531_v27 = vsub.f32 %v522_v22, %v527_v26 }
 0x2a1   : > { %v535_v28 = vmul.f32 1.442695, %v532_v25 }
 0x2a2   : > { %v533_v29 = vmul.f32 1.442695, %v531_v27 }
 0x2a3   : > { %967 = vpow2.f32 %v535_v28 }
 0x2a4   : > { %969 = vpow2.f32 %v533_v29 }
 0x2ad   : > { %v968_v30 = vpop.eup %967 }
 0x2ae   : > { %v970_v31 = vpop.eup %969  ;;  %v538_v34 = vsel %vm1513_vm3, %v968_v30, 0.0 }
 0x2af   : > { %v537_v32 = vsel %vm1517_vm5, %v970_v31, 0.0  ;;  %v542_v35 = vsel %vm524_vm4, %v538_v34, 0.0 }
 0x2b0   : > { %v539_v33 = vsel %vm524_vm4, %v537_v32, 0.0 }
 0x2b1   : > { %540 = vadd.xlane.f32.xlu1 %v539_v33 }
 0x2b5   : > { %543 = vadd.xlane.f32.xlu1 %v542_v35 }
 0x33e   : > { %v541_v38 = vpop.xlane.xlu1 %540 }
 0x33f   : > { %vm545_vm7 = vcmp.gt.f32.partialorder %v541_v38, 0.0 }
 0x340   : > { %v547_v39 = vsel %vm545_vm7, %v541_v38, 1.0 }
 0x341   : > { %971 = vrcp.f32 %v547_v39 }
 0x342   : > { %v544_v40 = vpop.xlane.xlu1 %543 }
 0x343   : > { %vm546_vm8 = vcmp.gt.f32.partialorder %v544_v40, 0.0 }
 0x344   : > { %v548_v41 = vsel %vm546_vm8, %v544_v40, 1.0 }
 0x345   : > { %973 = vrcp.f32 %v548_v41 }
 0x34b   : > { %v972_v42 = vpop.eup %971 }
 0x34c   : > { %v551_v43 = vmul.f32 %v972_v42, %v547_v39 }
 0x34e   : > { %v553_v44 = vsub.f32 2.0, %v551_v43 }
 0x34f   : > { %v974_v45 = vpop.eup %973 }
 0x350   : > { %v552_v46 = vmul.f32 %v974_v45, %v548_v41  ;;  %v555_v47 = vmul.f32 %v972_v42, %v553_v44 }
 0x352   : > { %v554_v48 = vsub.f32 2.0, %v552_v46  ;;  %v557_v50 = vmul.f32 %v555_v47, %v537_v32 }
 0x354   : > { %v556_v49 = vmul.f32 %v974_v45, %v554_v48 }
 0x356   : > { %v558_v51 = vmul.f32 %v556_v49, %v538_v34 }
 0x358   : > { %v890_v52 = vpack.c.bf16 %v558_v51, %v557_v50 }
 0x35a   : > { %892 = vmatpush3.bf16.xpose.msk.msra.mxu1 %vm891_vm9, %v890_v52 }
 0x361   : > { %887 = vmatmul.mubr.msk.f32.vlgmr.msra.gmra.mrb[0].mxu1 %vm524_vm4, %v393_v53 }
 0x434   : > { %v634_v54 = vpop.f32.mrb[0].mxu1 }
 0x435   : > { %v888_v55 = vpop.f32.mrb[1].mxu1  ;;  %v638_v56 = vsel %vm524_vm4, %v634_v54, 0.0  ;;  %v647_v57 = vmul.f32 %v634_v54, %v634_v54 }
 0x436   : > { %639 = vadd.xlane.f32.xlu1 %v638_v56 }
 0x437   : > { %v648_v58 = vsel %vm524_vm4, %v647_v57, 0.0 }
 0x43a   : > { %649 = vadd.xlane.f32.xlu1 %v648_v58 }
 0x4c3   : > { %v640_v59 = vpop.xlane.xlu1 %639 }
 0x4c4   : > { %v641_v60 = vrot.slane %v640_v59, 4 }
 0x4c6   : > { %v642_v61 = vadd.f32 %v641_v60, %v640_v59 }
 0x4c7   : > { %v650_v62 = vpop.xlane.xlu1 %649 }
 0x4c8   : > { %v643_v63 = vrot.slane %v642_v61, 2  ;;  %v651_v0 = vrot.slane %v650_v62, 4 }
 0x4ca   : > { %v644_v1 = vadd.f32 %v643_v63, %v642_v61  ;;  %v652_v2 = vadd.f32 %v651_v0, %v650_v62 }
 0x4cc   : > { %v645_v3 = vrot.slane %v644_v1, 1  ;;  %v653_v4 = vrot.slane %v652_v2, 2 }
 0x4ce   : > { %v646_v5 = vadd.f32 %v645_v3, %v644_v1  ;;  %v654_v6 = vadd.f32 %v653_v4, %v652_v2 }
 0x4d0   : > { %v658_v7 = vmul.f32 0.0078125, %v646_v5  ;;  %v655_v8 = vrot.slane %v654_v6, 1 }
 0x4d2   : > { %v656_v9 = vadd.f32 %v655_v8, %v654_v6  ;;  %v660_v10 = vmul.f32 %v658_v7, %v658_v7  ;;  %v663_v15 = vsub.f32 %v634_v54, %v658_v7 }
 0x4d4   : > { %v659_v11 = vmul.f32 0.0078125, %v656_v9 }
 0x4d6   : > { %v661_v12 = vsub.f32 %v659_v11, %v660_v10 }
 0x4d8   : > { %v662_v13 = vmax.f32 %v661_v12, 0.0 }
 0x4da   : > { %v664_v14 = vadd.f32 1e-05, %v662_v13 }
 0x4dc   : > { %975 = vrsqrt.f32 %v664_v14 }
 0x4e6   : > { %v976_v16 = vpop.eup %975 }
 0x4e7   : > { %v666_v17 = vmul.f32 %v976_v16, %v663_v15 }
 0x4e9   : > { %667 = vst.msk [vmem:[%s387_s26] sm:$0xff] %vm524_vm4, %v666_v17 }
 0x4ea   : > { %1140 = shalt.err (!%p1137_p3)
}
 0x4eb   : > { %s1141_s23 = scalar_lea.hbm %s1545_s8, 128  ;;  %s1145_s9 = scalar_lea.hbm %s1595_s5, 256 }
 0x4ec   : > { %p1142_p13 = scmp.ne.s32.totalorder %s1545_s8, %s1141_s23  ;;  %p1146_p10 = scmp.lt.u32.totalorder %s1545_s8, %s1595_s5 }
 0x4ed   : > { %p1147_p1 = scmp.lt.u32.totalorder %s1145_s9, %s1141_s23  ;;  %p1149_p6 = scmp.lt.u32.totalorder %s1141_s23, %s1545_s8 }
 0x4ee   : > { %p1143_p9 = pnand %p1142_p13, %p1627_p7 }
 0x4ef   : > { %p1148_p11 = por %p1147_p1, %p1146_p10 }
 0x4f0   : > { %p1144_p8 = pneg %p1143_p9 }
 0x4f1   : > { %p1150_p12 = por %p1149_p6, %p1148_p11 }
 0x4f3   : > { %p1151_p2 = pnand %p1150_p12, %p1144_p8 }
 0x4f5   : > { %1154 = shalt.err (!%p1151_p2)
}
 0x4f6   : > { %903 = dma.vmem_to_hbm [thread:$0]  (%p1627_p7), %s1547_s27, 128, %s1545_s8, %s669_s25  }
 0x4f7 PF: > { %s1628_s13 = sld [smem:[#allocation19_spill]]  ;;  %s694_s7 = sand.u32 1, %s1189_s18  }
 0x4f8   : > { %p1630_p0 = scmp.ge.s32.totalorder %s1201_s21, 2  ;;  %s695_s17 = scalar_lea.sflag [#allocation4], %s694_s7 }
 0x4fd   : > { %p1629_p4 = scmp.ne.s32.totalorder %s1628_s13, 0 }
 0x4ff   : > { %p922_p5 = pnand %p1630_p0, %p1629_p4 }
 0x501   : > { %1184 = dma.done.wait (!%p922_p5), %s695_s17, 128  }
 0x502   : > { %1186 = vsyncadd (!%p922_p5), %s695_s17, 4294967168  ;;  %s1631_s21 = sld [smem:[#allocation17_spill]]  ;;  %s1632_s3 = sld [smem:[#allocation16_spill]] }
 0x503   : > { %s1633_s20 = sld [smem:[#allocation18_spill]]  ;;  %s1634_s18 = smov %s1193_s19 }
 0x508   : > { %p24_p3 = scmp.ge.s32.totalorder %s1631_s21, 4   ;;  %s1635_s19 = smov %s1632_s3 }
 0x50a   :  { %26 = sbr.rel (!%p24_p3) target bundleno = 12 (0xc), region = 133 }
 0x511   :  { %700 = vsyncpa [#allocation3], 1 }
 0x512   :  { %702 = vsyncpa [#allocation3 + $0x1], 1 }
 0x513   :  { %703 = vsyncpa [#allocation6], 1 }
 0x514   :  { %705 = vsyncpa [#allocation6 + $0x1], 1 }
 0x515   :  { %706 = vsyncpa [#allocation9], 1 }
 0x516   :  { %708 = vsyncpa [#allocation9 + $0x1], 1 }
 0x517   :  { %709 = vsyncpa [#allocation4], 1 }
 0x518   :  { %711 = vsyncpa [#allocation4 + $0x1], 1 }

</bundles_post_ra>
